<compile_context>
chip_gen: v6e
topology: v6e:2x2x1
jax: 0.10.0
libtpu: 0.0.40
codegen_flags: <defaults>
</compile_context>

<pallas_src>
import math

import jax
import jax.numpy as jnp
from jax.experimental import pallas as pl
from jax.experimental.pallas import tpu as pltpu

# Model dims (from the PyTorch module)
H1, H2, H3, H4 = 128, 64, 32, 16
N_CLASSES = 10
N_FEATURES = 41


def _round_up(n, m):
    return ((n + m - 1) // m) * m


def _sigmoid_via_tanh(h):
    # sigmoid(h) == 0.5 * (tanh(0.5 * h) + 1): single EUP op + VPU mul/add.
    return 0.5 * (jnp.tanh(0.5 * h) + 1.0)


def _mlp_kernel(x_ref,
                w1_ref, b1_ref,
                w2_ref, b2_ref,
                w3_ref, b3_ref,
                w4_ref, b4_ref,
                w5_ref, b5_ref,
                o_ref):
    # x and weights arrive as bf16; accumulate in f32 on the MXU.
    x = x_ref[...]

    h = jnp.dot(x, w1_ref[...], preferred_element_type=jnp.float32) + b1_ref[...]
    h = jnp.tanh(h)

    h = jnp.dot(h.astype(jnp.bfloat16), w2_ref[...],
                preferred_element_type=jnp.float32) + b2_ref[...]
    h = jnp.tanh(h)

    h = jnp.dot(h.astype(jnp.bfloat16), w3_ref[...],
                preferred_element_type=jnp.float32) + b3_ref[...]
    h = _sigmoid_via_tanh(h)

    h = jnp.dot(h.astype(jnp.bfloat16), w4_ref[...],
                preferred_element_type=jnp.float32) + b4_ref[...]
    h = _sigmoid_via_tanh(h)

    h = jnp.dot(h.astype(jnp.bfloat16), w5_ref[...],
                preferred_element_type=jnp.float32) + b5_ref[...]

    o_ref[...] = h.astype(o_ref.dtype)


def model_attack_cat_forward(x, params, tm=1024):
    """x: (B, 41) float32. params: dict of transposed weights (in, out) and (1, out) biases."""
    B = x.shape[0]

    # Tile size: multiple of 8 sublanes, capped at 1024 rows per grid step.
    tm = min(tm, _round_up(max(B, 1), 8))
    tm = _round_up(tm, 8)
    B_pad = _round_up(B, tm)
    grid = (B_pad // tm,)

    # bf16 MXU operands (halves HBM read traffic for x); biases stay f32.
    x_bf16 = x.astype(jnp.bfloat16)
    if B_pad != B:
        x_bf16 = jnp.pad(x_bf16, ((0, B_pad - B), (0, 0)))

    w1 = params["w1"].astype(jnp.bfloat16)
    w2 = params["w2"].astype(jnp.bfloat16)
    w3 = params["w3"].astype(jnp.bfloat16)
    w4 = params["w4"].astype(jnp.bfloat16)
    w5 = params["w5"].astype(jnp.bfloat16)
    b1, b2, b3, b4, b5 = (params["b1"], params["b2"], params["b3"],
                          params["b4"], params["b5"])

    def const_spec(shape):
        # Weights / biases: same (only) block every grid step -> stay resident.
        return pl.BlockSpec(shape, lambda i: (0, 0))

    in_specs = [
        pl.BlockSpec((tm, N_FEATURES), lambda i: (i, 0)),       # x tile
        const_spec((N_FEATURES, H1)), const_spec((1, H1)),
        const_spec((H1, H2)), const_spec((1, H2)),
        const_spec((H2, H3)), const_spec((1, H3)),
        const_spec((H3, H4)), const_spec((1, H4)),
        const_spec((H4, N_CLASSES)), const_spec((1, N_CLASSES)),
    ]
    out_spec = pl.BlockSpec((tm, N_CLASSES), lambda i: (i, 0))

    out = pl.pallas_call(
        _mlp_kernel,
        out_shape=jax.ShapeDtypeStruct((B_pad, N_CLASSES), jnp.float32),
        grid=grid,
        in_specs=in_specs,
        out_specs=out_spec,
        compiler_params=pltpu.CompilerParams(
            dimension_semantics=("parallel",)),
    )(x_bf16, w1, b1, w2, b2, w3, b3, w4, b4, w5, b5)

    return out[:B]


def init_params(key):
    """Deterministic init mimicking PyTorch nn.Linear defaults (U[-1/sqrt(fan_in), +]).
    Weights are stored transposed as (in_features, out_features)."""
    dims = [(N_FEATURES, H1), (H1, H2), (H2, H3), (H3, H4), (H4, N_CLASSES)]
    params = {}
    keys = jax.random.split(key, 2 * len(dims))
    for i, (fan_in, fan_out) in enumerate(dims):
        bound = 1.0 / math.sqrt(fan_in)
        w = jax.random.uniform(keys[2 * i], (fan_in, fan_out),
                               minval=-bound, maxval=bound, dtype=jnp.float32)
        b = jax.random.uniform(keys[2 * i + 1], (1, fan_out),
                               minval=-bound, maxval=bound, dtype=jnp.float32)
        params[f"w{i + 1}"] = w
        params[f"b{i + 1}"] = b
    return params


def reference_forward(x, params):
    """Pure-JAX f32 reference (matches the PyTorch module semantics)."""
    h = jnp.tanh(x @ params["w1"] + params["b1"])
    h = jnp.tanh(h @ params["w2"] + params["b2"])
    h = jax.nn.sigmoid(h @ params["w3"] + params["b3"])
    h = jax.nn.sigmoid(h @ params["w4"] + params["b4"])
    return h @ params["w5"] + params["b5"]


if __name__ == "__main__":
    key = jax.random.PRNGKey(0)
    pkey, xkey = jax.random.split(key)
    params = init_params(pkey)

    B = 8
    x = jax.random.normal(xkey, (B, N_FEATURES), dtype=jnp.float32)

    out = model_attack_cat_forward(x, params)
    out = jax.block_until_ready(out)

    ref = reference_forward(x, params)
    assert out.shape == (B, N_CLASSES)
    # bf16 MXU operands (f32 accumulation) -> relaxed tolerance vs f32 reference.
    assert jnp.allclose(out, ref, atol=5e-2, rtol=5e-2), \
        f"max abs err {jnp.max(jnp.abs(out - ref))}"

    print("KERNEL_OK")
</pallas_src>

<mosaic_0001>
module attributes {stable_mosaic.version = 11 : i64} {
  func.func @_mlp_kernel(%arg0: i32, %arg1: memref<8x41xbf16, #tpu.memory_space<vmem>>, %arg2: memref<41x128xbf16, #tpu.memory_space<vmem>>, %arg3: memref<1x128xf32, #tpu.memory_space<vmem>>, %arg4: memref<128x64xbf16, #tpu.memory_space<vmem>>, %arg5: memref<1x64xf32, #tpu.memory_space<vmem>>, %arg6: memref<64x32xbf16, #tpu.memory_space<vmem>>, %arg7: memref<1x32xf32, #tpu.memory_space<vmem>>, %arg8: memref<32x16xbf16, #tpu.memory_space<vmem>>, %arg9: memref<1x16xf32, #tpu.memory_space<vmem>>, %arg10: memref<16x10xbf16, #tpu.memory_space<vmem>>, %arg11: memref<1x10xf32, #tpu.memory_space<vmem>>, %arg12: memref<8x10xf32, #tpu.memory_space<vmem>>) attributes {dimension_semantics = [#tpu.dimension_semantics<parallel>], iteration_bounds = array<i64: 1>, scalar_prefetch = 0 : i64, scratch_operands = 0 : i64, tpu.core_type = #tpu.core_type<tc>, window_params = [{transform_indices = @transform_0, window_bounds = array<i64: 8, 41>}, {pipeline_mode = #tpu.pipeline_mode<synchronous>, transform_indices = @transform_1, window_bounds = array<i64: 41, 128>}, {pipeline_mode = #tpu.pipeline_mode<synchronous>, transform_indices = @transform_2, window_bounds = array<i64: 1, 128>}, {pipeline_mode = #tpu.pipeline_mode<synchronous>, transform_indices = @transform_3, window_bounds = array<i64: 128, 64>}, {pipeline_mode = #tpu.pipeline_mode<synchronous>, transform_indices = @transform_4, window_bounds = array<i64: 1, 64>}, {pipeline_mode = #tpu.pipeline_mode<synchronous>, transform_indices = @transform_5, window_bounds = array<i64: 64, 32>}, {pipeline_mode = #tpu.pipeline_mode<synchronous>, transform_indices = @transform_6, window_bounds = array<i64: 1, 32>}, {pipeline_mode = #tpu.pipeline_mode<synchronous>, transform_indices = @transform_7, window_bounds = array<i64: 32, 16>}, {pipeline_mode = #tpu.pipeline_mode<synchronous>, transform_indices = @transform_8, window_bounds = array<i64: 1, 16>}, {pipeline_mode = #tpu.pipeline_mode<synchronous>, transform_indices = @transform_9, window_bounds = array<i64: 16, 10>}, {pipeline_mode = #tpu.pipeline_mode<synchronous>, transform_indices = @transform_10, window_bounds = array<i64: 1, 10>}, {transform_indices = @transform_11, window_bounds = array<i64: 8, 10>}]} {
    %c0 = arith.constant 0 : index
    %c0_0 = arith.constant 0 : index
    %0 = vector.load %arg1[%c0, %c0_0] : memref<8x41xbf16, #tpu.memory_space<vmem>>, vector<8x41xbf16>
    %c0_1 = arith.constant 0 : index
    %c0_2 = arith.constant 0 : index
    %1 = vector.load %arg2[%c0_1, %c0_2] : memref<41x128xbf16, #tpu.memory_space<vmem>>, vector<41x128xbf16>
    %cst = arith.constant dense<0.000000e+00> : vector<8x128xf32>
    %2 = tpu.matmul %0, %1, %cst {dimension_numbers = #tpu.dot_dimension_numbers<[1], [0], [0], [1], [0, 0, 1, 1], [], []>} : vector<8x41xbf16>, vector<41x128xbf16>, vector<8x128xf32> -> vector<8x128xf32>
    %c0_3 = arith.constant 0 : index
    %c0_4 = arith.constant 0 : index
    %3 = vector.load %arg3[%c0_3, %c0_4] : memref<1x128xf32, #tpu.memory_space<vmem>>, vector<1x128xf32>
    %4 = vector.broadcast %3 : vector<1x128xf32> to vector<8x128xf32>
    %5 = arith.addf %2, %4 : vector<8x128xf32>
    %6 = math.tanh %5 : vector<8x128xf32>
    %7 = arith.truncf %6 : vector<8x128xf32> to vector<8x128xbf16>
    %c0_5 = arith.constant 0 : index
    %c0_6 = arith.constant 0 : index
    %8 = vector.load %arg4[%c0_5, %c0_6] : memref<128x64xbf16, #tpu.memory_space<vmem>>, vector<128x64xbf16>
    %cst_7 = arith.constant dense<0.000000e+00> : vector<8x64xf32>
    %9 = tpu.matmul %7, %8, %cst_7 {dimension_numbers = #tpu.dot_dimension_numbers<[1], [0], [0], [1], [0, 0, 1, 1], [], []>} : vector<8x128xbf16>, vector<128x64xbf16>, vector<8x64xf32> -> vector<8x64xf32>
    %c0_8 = arith.constant 0 : index
    %c0_9 = arith.constant 0 : index
    %10 = vector.load %arg5[%c0_8, %c0_9] : memref<1x64xf32, #tpu.memory_space<vmem>>, vector<1x64xf32>
    %11 = vector.broadcast %10 : vector<1x64xf32> to vector<8x64xf32>
    %12 = arith.addf %9, %11 : vector<8x64xf32>
    %13 = math.tanh %12 : vector<8x64xf32>
    %14 = arith.truncf %13 : vector<8x64xf32> to vector<8x64xbf16>
    %c0_10 = arith.constant 0 : index
    %c0_11 = arith.constant 0 : index
    %15 = vector.load %arg6[%c0_10, %c0_11] : memref<64x32xbf16, #tpu.memory_space<vmem>>, vector<64x32xbf16>
    %cst_12 = arith.constant dense<0.000000e+00> : vector<8x32xf32>
    %16 = tpu.matmul %14, %15, %cst_12 {dimension_numbers = #tpu.dot_dimension_numbers<[1], [0], [0], [1], [0, 0, 1, 1], [], []>} : vector<8x64xbf16>, vector<64x32xbf16>, vector<8x32xf32> -> vector<8x32xf32>
    %c0_13 = arith.constant 0 : index
    %c0_14 = arith.constant 0 : index
    %17 = vector.load %arg7[%c0_13, %c0_14] : memref<1x32xf32, #tpu.memory_space<vmem>>, vector<1x32xf32>
    %18 = vector.broadcast %17 : vector<1x32xf32> to vector<8x32xf32>
    %19 = arith.addf %16, %18 : vector<8x32xf32>
    %cst_15 = arith.constant 5.000000e-01 : f32
    %20 = vector.broadcast %cst_15 : f32 to vector<8x32xf32>
    %21 = arith.mulf %20, %19 : vector<8x32xf32>
    %22 = math.tanh %21 : vector<8x32xf32>
    %cst_16 = arith.constant 1.000000e+00 : f32
    %23 = vector.broadcast %cst_16 : f32 to vector<8x32xf32>
    %24 = arith.addf %22, %23 : vector<8x32xf32>
    %cst_17 = arith.constant 5.000000e-01 : f32
    %25 = vector.broadcast %cst_17 : f32 to vector<8x32xf32>
    %26 = arith.mulf %25, %24 : vector<8x32xf32>
    %27 = arith.truncf %26 : vector<8x32xf32> to vector<8x32xbf16>
    %c0_18 = arith.constant 0 : index
    %c0_19 = arith.constant 0 : index
    %28 = vector.load %arg8[%c0_18, %c0_19] : memref<32x16xbf16, #tpu.memory_space<vmem>>, vector<32x16xbf16>
    %cst_20 = arith.constant dense<0.000000e+00> : vector<8x16xf32>
    %29 = tpu.matmul %27, %28, %cst_20 {dimension_numbers = #tpu.dot_dimension_numbers<[1], [0], [0], [1], [0, 0, 1, 1], [], []>} : vector<8x32xbf16>, vector<32x16xbf16>, vector<8x16xf32> -> vector<8x16xf32>
    %c0_21 = arith.constant 0 : index
    %c0_22 = arith.constant 0 : index
    %30 = vector.load %arg9[%c0_21, %c0_22] : memref<1x16xf32, #tpu.memory_space<vmem>>, vector<1x16xf32>
    %31 = vector.broadcast %30 : vector<1x16xf32> to vector<8x16xf32>
    %32 = arith.addf %29, %31 : vector<8x16xf32>
    %cst_23 = arith.constant 5.000000e-01 : f32
    %33 = vector.broadcast %cst_23 : f32 to vector<8x16xf32>
    %34 = arith.mulf %33, %32 : vector<8x16xf32>
    %35 = math.tanh %34 : vector<8x16xf32>
    %cst_24 = arith.constant 1.000000e+00 : f32
    %36 = vector.broadcast %cst_24 : f32 to vector<8x16xf32>
    %37 = arith.addf %35, %36 : vector<8x16xf32>
    %cst_25 = arith.constant 5.000000e-01 : f32
    %38 = vector.broadcast %cst_25 : f32 to vector<8x16xf32>
    %39 = arith.mulf %38, %37 : vector<8x16xf32>
    %40 = arith.truncf %39 : vector<8x16xf32> to vector<8x16xbf16>
    %c0_26 = arith.constant 0 : index
    %c0_27 = arith.constant 0 : index
    %41 = vector.load %arg10[%c0_26, %c0_27] : memref<16x10xbf16, #tpu.memory_space<vmem>>, vector<16x10xbf16>
    %cst_28 = arith.constant dense<0.000000e+00> : vector<8x10xf32>
    %42 = tpu.matmul %40, %41, %cst_28 {dimension_numbers = #tpu.dot_dimension_numbers<[1], [0], [0], [1], [0, 0, 1, 1], [], []>} : vector<8x16xbf16>, vector<16x10xbf16>, vector<8x10xf32> -> vector<8x10xf32>
    %c0_29 = arith.constant 0 : index
    %c0_30 = arith.constant 0 : index
    %43 = vector.load %arg11[%c0_29, %c0_30] : memref<1x10xf32, #tpu.memory_space<vmem>>, vector<1x10xf32>
    %44 = vector.broadcast %43 : vector<1x10xf32> to vector<8x10xf32>
    %45 = arith.addf %42, %44 : vector<8x10xf32>
    %c0_31 = arith.constant 0 : index
    %c0_32 = arith.constant 0 : index
    %46 = vector.load %arg12[%c0_31, %c0_32] : memref<8x10xf32, #tpu.memory_space<vmem>>, vector<8x10xf32>
    tpu.vector_store %arg12[%c0_31, %c0_32], %45 {strides = array<i32>} : memref<8x10xf32, #tpu.memory_space<vmem>>, vector<8x10xf32>,
    return
  }
  func.func @transform_0(%arg0: i32) -> (i32, i32) {
    %c0_i32 = arith.constant 0 : i32
    %c0_i32_0 = arith.constant 0 : i32
    return %arg0, %c0_i32 : i32, i32
  }
  func.func @transform_1(%arg0: i32) -> (i32, i32) {
    %c0_i32 = arith.constant 0 : i32
    %c0_i32_0 = arith.constant 0 : i32
    %c0_i32_1 = arith.constant 0 : i32
    return %c0_i32, %c0_i32_0 : i32, i32
  }
  func.func @transform_2(%arg0: i32) -> (i32, i32) {
    %c0_i32 = arith.constant 0 : i32
    %c0_i32_0 = arith.constant 0 : i32
    %c0_i32_1 = arith.constant 0 : i32
    return %c0_i32, %c0_i32_0 : i32, i32
  }
  func.func @transform_3(%arg0: i32) -> (i32, i32) {
    %c0_i32 = arith.constant 0 : i32
    %c0_i32_0 = arith.constant 0 : i32
    %c0_i32_1 = arith.constant 0 : i32
    return %c0_i32, %c0_i32_0 : i32, i32
  }
  func.func @transform_4(%arg0: i32) -> (i32, i32) {
    %c0_i32 = arith.constant 0 : i32
    %c0_i32_0 = arith.constant 0 : i32
    %c0_i32_1 = arith.constant 0 : i32
    return %c0_i32, %c0_i32_0 : i32, i32
  }
  func.func @transform_5(%arg0: i32) -> (i32, i32) {
    %c0_i32 = arith.constant 0 : i32
    %c0_i32_0 = arith.constant 0 : i32
    %c0_i32_1 = arith.constant 0 : i32
    return %c0_i32, %c0_i32_0 : i32, i32
  }
  func.func @transform_6(%arg0: i32) -> (i32, i32) {
    %c0_i32 = arith.constant 0 : i32
    %c0_i32_0 = arith.constant 0 : i32
    %c0_i32_1 = arith.constant 0 : i32
    return %c0_i32, %c0_i32_0 : i32, i32
  }
  func.func @transform_7(%arg0: i32) -> (i32, i32) {
    %c0_i32 = arith.constant 0 : i32
    %c0_i32_0 = arith.constant 0 : i32
    %c0_i32_1 = arith.constant 0 : i32
    return %c0_i32, %c0_i32_0 : i32, i32
  }
  func.func @transform_8(%arg0: i32) -> (i32, i32) {
    %c0_i32 = arith.constant 0 : i32
    %c0_i32_0 = arith.constant 0 : i32
    %c0_i32_1 = arith.constant 0 : i32
    return %c0_i32, %c0_i32_0 : i32, i32
  }
  func.func @transform_9(%arg0: i32) -> (i32, i32) {
    %c0_i32 = arith.constant 0 : i32
    %c0_i32_0 = arith.constant 0 : i32
    %c0_i32_1 = arith.constant 0 : i32
    return %c0_i32, %c0_i32_0 : i32, i32
  }
  func.func @transform_10(%arg0: i32) -> (i32, i32) {
    %c0_i32 = arith.constant 0 : i32
    %c0_i32_0 = arith.constant 0 : i32
    %c0_i32_1 = arith.constant 0 : i32
    return %c0_i32, %c0_i32_0 : i32, i32
  }
  func.func @transform_11(%arg0: i32) -> (i32, i32) {
    %c0_i32 = arith.constant 0 : i32
    %c0_i32_0 = arith.constant 0 : i32
    return %arg0, %c0_i32 : i32, i32
  }
}

</mosaic_0001>

<bundles_post_ra>
// kernel: tpu_custom_call.1
= control target key start
LH: loop header
LB: loop body
LE: loop exit
PB: predicated region body
PF: predicated region fallthrough
CT: control target
= control target key end

     0   :  { %vm75_vm0 = vcmask 1043456   ;;  %v630_v0 = vmov 0.0   ;;  %vm76_vm1 = vcmask 1044480   ;;  %v631_v2 = vmov 65535   ;;  %s798_s0 = inlined_call_operand.vmem [shape: bf16[8,41], index: 0, kind: input, shape index: {}]   ;;  %s799_s1 = inlined_call_operand.vmem [shape: bf16[41,128], index: 1, kind: input, shape index: {}]   ;;  %s800_s2 = inlined_call_operand.vmem [shape: f32[1,128], index: 2, kind: input, shape index: {}]   ;;  %s801_s3 = inlined_call_operand.vmem [shape: bf16[128,64], index: 3, kind: input, shape index: {}]   ;;  %s802_s4 = inlined_call_operand.vmem [shape: f32[1,64], index: 4, kind: input, shape index: {}]   ;;  %s803_s5 = inlined_call_operand.vmem [shape: bf16[64,32], index: 5, kind: input, shape index: {}]   ;;  %s804_s6 = inlined_call_operand.vmem [shape: f32[1,32], index: 6, kind: input, shape index: {}]   ;;  %s805_s7 = inlined_call_operand.vmem [shape: bf16[32,16], index: 7, kind: input, shape index: {}]   ;;  %s806_s8 = inlined_call_operand.vmem [shape: f32[1,16], index: 8, kind: input, shape index: {}]   ;;  %s807_s9 = inlined_call_operand.vmem [shape: bf16[16,10], index: 9, kind: input, shape index: {}]   ;;  %s808_s10 = inlined_call_operand.vmem [shape: f32[1,10], index: 10, kind: input, shape index: {}]   ;;  %s809_s11 = inlined_call_operand.hbm [shape: f32[8,10], index: 11, kind: output, shape index: {}]  }
   0x1   :  { %522 = vmatprep.subr.bf16.mxu0 %v630_v0  ;;  %v582_v1 = vld [vmem:[%s799_s1 + $0x10] sm:$0x1f]   ;;  %532 = vmatprep.subr.bf16.mxu1 %v630_v0  ;;  %v77_v3 = vsel %vm75_vm0, 4294967295, %v631_v2  ;;  %vm632_vm2 = vmmov 0   ;;  %v585_v6 = vld [vmem:[%s801_s3 + $0x38] sm:$0xff]   ;;  %v583_v7 = vld [vmem:[%s799_s1 + $0x8] sm:$0xff]  }
   0x2   :  { %v78_v4 = vsel %vm76_vm1, %v77_v3, 0  ;;  %528 = vmatprep.mubr.msk.bf16.mxu0 %vm632_vm2, %v630_v0  ;;  %548 = vmatprep.mubr.msk.bf16.mxu1 %vm632_vm2, %v630_v0  ;;  %vm71_vm3 = vcmask 334848   ;;  %v586_v8 = vld [vmem:[%s801_s3 + $0x30] sm:$0xff]   ;;  %v584_v9 = vld [vmem:[%s799_s1] sm:$0xff]   ;;  %v587_v10 = vld [vmem:[%s801_s3 + $0x28] sm:$0xff]  }
   0x3   :  { %v80_v5 = vand.u32 %v582_v1, %v78_v4  ;;  %533 = vmatpush3.bf16.msra.mxu1 %v585_v6  ;;  %v40_v11 = vld [vmem:[%s798_s0] sm:$0xf] }
   0x4   :  { %534 = vmatprep.subr.bf16.mxu1 %v630_v0 }
   0x5   :  { %523 = vmatpush3.bf16.msra.mxu0 %v80_v5 }
   0x6   :  { %524 = vmatprep.subr.bf16.mxu0 %v630_v0 }
   0x7   :  { %535 = vmatpush3.bf16.msra.mxu1 %v586_v8 }
   0x8   :  { %536 = vmatprep.subr.bf16.mxu1 %v630_v0 }
   0x9   :  { %525 = vmatpush3.bf16.msra.mxu0 %v583_v7 }
   0xa   :  { %526 = vmatprep.subr.bf16.mxu0 %v630_v0 }
   0xb   :  { %537 = vmatpush3.bf16.msra.mxu1 %v587_v10 }
   0xd   :  { %527 = vmatpush3.bf16.msra.mxu0 %v584_v9 }
   0xe   :  { %552 = vmatprep.subr.bf16.mxu0 %v630_v0 }
   0xf   :  { %16 = vsyncpa [#allocation3], 0  ;;  %538 = vmatprep.subr.bf16.mxu1 %v630_v0  ;;  %v588_v12 = vld [vmem:[%s801_s3 + $0x20] sm:$0xff]   ;;  %v589_v13 = vld [vmem:[%s801_s3 + $0x18] sm:$0xff]   ;;  %vm276_vm4 = vcmask 523264   ;;  %vm348_vm5 = vcmask 261120  }
  0x10   :  { %529 = vmatmul.mubr.msk.bf16.vlgmr.msra.gmra.mxu0 %vm71_vm3, %v40_v11  ;;  %539 = vmatpush3.bf16.msra.mxu1 %v588_v12  ;;  %v590_v14 = vld [vmem:[%s801_s3 + $0x10] sm:$0xff]   ;;  %v591_v15 = vld [vmem:[%s801_s3 + $0x8] sm:$0xff]   ;;  %v592_v16 = vld [vmem:[%s801_s3] sm:$0xff]   ;;  %vm412_vm6 = vcmask 130048   ;;  %s633_s16 = smov [#allocation2]   ;;  %vm456_vm7 = vcmask 80896  }
  0x11   :  { %560 = vmatprep.mubr.msk.bf16.mxu0 %vm632_vm2, %v630_v0  ;;  %540 = vmatprep.subr.bf16.mxu1 %v630_v0  ;;  %v472_v17 = vld [vmem:[%s800_s2] ss:$0 sm:$0xff]  ;;  %v593_v25 = vld [vmem:[%s803_s5 + $0x18] sm:$0xff]   ;;  %v594_v26 = vld [vmem:[%s803_s5 + $0x10] sm:$0xff]   ;;  %s464_s17 = sshll.u32 %s633_s16, 4  ;;  %s465_s17 = int_to_ptr.vmem [resolvable:$true] %s464_s17 }
  0x12   :  { %553 = vmatpush3.bf16.msra.mxu0 %v593_v25  ;;  %v595_v27 = vld [vmem:[%s803_s5 + $0x8] sm:$0xff]   ;;  %v596_v28 = vld [vmem:[%s803_s5] sm:$0xff]   ;;  %p613_p1 = scmp.lt.s32.totalorder %s465_s17, %s465_s17 }
  0x13   :  { %554 = vmatprep.subr.bf16.mxu0 %v630_v0  ;;  %v477_v29 = vld [vmem:[%s802_s4] ss:$0 sm:$0xff]  ;;  %v597_v37 = vld [vmem:[%s805_s7 + $0x8] sm:$0xff]  }
  0x14   :  { %541 = vmatpush3.bf16.msra.mxu1 %v589_v13  ;;  %v598_v38 = vld [vmem:[%s805_s7] sm:$0xff]  }
  0x15   :  { %542 = vmatprep.subr.bf16.mxu1 %v630_v0  ;;  %v486_v39 = vld [vmem:[%s804_s6] ss:$0 sm:$0xff] }
  0x16   :  { %555 = vmatpush3.bf16.msra.mxu0 %v594_v26  ;;  %v599_v50 = vld [vmem:[%s807_s9] sm:$0xff]  }
  0x17   :  { %556 = vmatprep.subr.bf16.mxu0 %v630_v0  ;;  %v492_v51 = vld [vmem:[%s806_s8] ss:$0 sm:$0xff]  ;;  %s608_s8 = scalar_lea.vmem %s465_s17, 128 }
  0x18   :  { %543 = vmatpush3.bf16.msra.mxu1 %v590_v14  ;;  %v496_v62 = vld [vmem:[%s808_s10] ss:$0 sm:$0xff]  ;;  %p609_p0 = scmp.ne.s32.totalorder %s465_s17, %s608_s8  ;;  %p614_p2 = scmp.lt.s32.totalorder %s608_s8, %s608_s8 }
  0x19   :  { %544 = vmatprep.subr.bf16.mxu1 %v630_v0 }
  0x1a   :  { %557 = vmatpush3.bf16.msra.mxu0 %v595_v27  ;;  %p615_p3 = por %p614_p2, %p613_p1 }
  0x1b   :  { %558 = vmatprep.subr.bf16.mxu0 %v630_v0 }
  0x1c   :  { %545 = vmatpush3.bf16.msra.mxu1 %v591_v15  ;;  %p616_p4 = pnand %p615_p3, %p609_p0 }
  0x1d   :  { %546 = vmatprep.subr.bf16.mxu1 %v630_v0 }
  0x1e   :  { %559 = vmatpush3.bf16.msra.mxu0 %v596_v28 }
  0x1f   :  { %564 = vmatprep.subr.bf16.mxu0 %v630_v0 }
  0x20   :  { %547 = vmatpush3.bf16.msra.mxu1 %v592_v16 }
  0x21   :  { %572 = vmatprep.subr.bf16.mxu1 %v630_v0 }
  0xd0   :  { %v116_v18 = vpop.f32.mrf.mxu0 }
  0xd1   :  { %v117_v19 = vadd.f32 %v472_v17, %v116_v18 }
  0xd2   :  { %v530_v20 = vpop.f32.mrf.mxu0 }
  0xd3   :  { %600 = vtanh.f32 %v117_v19 }
  0xd4   :  { %v119_v21 = vpop.f32.mrf.mxu0 }
  0xd6   :  { %v531_v22 = vpop.f32.mrf.mxu0 }
  0xe0   :  { %v601_v23 = vpop.eup %600 }
  0xe1   :  { %v123_v24 = vpack.c.bf16 %v601_v23, %v601_v23 }
  0xe3   :  { %549 = vmatmul.mubr.bf16.vlgmr.msra.gmra.mxu1 %v123_v24 }
  0xe4   :  { %574 = vmatprep.mubr.msk.bf16.mxu1 %vm632_vm2, %v630_v0  ;;  %573 = vmatpush3.bf16.msra.mxu1 %v599_v50 }
 0x1a3   :  { %v229_v30 = vpop.f32.mrf.mxu1 }
 0x1a4   :  { %v230_v31 = vadd.f32 %v477_v29, %v229_v30 }
 0x1a5   :  { %v550_v32 = vpop.f32.mrf.mxu1 }
 0x1a6   :  { %602 = vtanh.f32 %v230_v31 }
 0x1a7   :  { %v232_v33 = vpop.f32.mrf.mxu1 }
 0x1a9   :  { %v551_v34 = vpop.f32.mrf.mxu1 }
 0x1b3   :  { %v603_v35 = vpop.eup %602 }
 0x1b4   :  { %v236_v36 = vpack.c.bf16 %v603_v35, %v603_v35 }
 0x1b6   :  { %561 = vmatmul.mubr.msk.bf16.vlgmr.msra.gmra.mxu0 %vm276_vm4, %v236_v36 }
 0x1b7   :  { %568 = vmatprep.mubr.msk.bf16.mxu0 %vm632_vm2, %v630_v0  ;;  %565 = vmatpush3.bf16.msra.mxu0 %v597_v37 }
 0x1b8   :  { %566 = vmatprep.subr.bf16.mxu0 %v630_v0 }
 0x1bb   :  { %567 = vmatpush3.bf16.msra.mxu0 %v598_v38 }
 0x276   :  { %v314_v40 = vpop.f32.mrf.mxu0 }
 0x277   :  { %v315_v41 = vadd.f32 %v486_v39, %v314_v40 }
 0x278   :  { %v562_v42 = vpop.f32.mrf.mxu0 }
 0x279   :  { %v320_v43 = vmul.f32 0.5, %v315_v41 }
 0x27a   :  { %v317_v44 = vpop.f32.mrf.mxu0 }
 0x27b   :  { %604 = vtanh.f32 %v320_v43 }
 0x27c   :  { %v563_v45 = vpop.f32.mrf.mxu0 }
 0x288   :  { %v605_v46 = vpop.eup %604 }
 0x289   :  { %v322_v47 = vadd.f32 1.0, %v605_v46 }
 0x28b   :  { %v323_v48 = vmul.f32 0.5, %v322_v47 }
 0x28d   :  { %v324_v49 = vpack.c.bf16 %v323_v48, %v323_v48 }
 0x28f   :  { %569 = vmatmul.mubr.msk.bf16.vlgmr.msra.gmra.mxu0 %vm348_vm5, %v324_v49 }
 0x34f   :  { %v386_v52 = vpop.f32.mrf.mxu0 }
 0x350   :  { %v387_v53 = vadd.f32 %v492_v51, %v386_v52 }
 0x351   :  { %v570_v54 = vpop.f32.mrf.mxu0 }
 0x352   :  { %v392_v55 = vmul.f32 0.5, %v387_v53 }
 0x353   :  { %v389_v56 = vpop.f32.mrf.mxu0 }
 0x354   :  { %606 = vtanh.f32 %v392_v55 }
 0x355   :  { %v571_v57 = vpop.f32.mrf.mxu0 }
 0x361   :  { %v607_v58 = vpop.eup %606 }
 0x362   :  { %v394_v59 = vadd.f32 1.0, %v607_v58 }
 0x364   :  { %v395_v60 = vmul.f32 0.5, %v394_v59 }
 0x366   :  { %v396_v61 = vpack.c.bf16 %v395_v60, %v395_v60 }
 0x368   :  { %575 = vmatmul.mubr.msk.bf16.vlgmr.msra.gmra.mxu1 %vm412_vm6, %v396_v61 }
 0x428   :  { %v450_v63 = vpop.f32.mrf.mxu1 }
 0x429   :  { %v451_v0 = vadd.f32 %v496_v62, %v450_v63 }
 0x42a   :  { %v576_v1 = vpop.f32.mrf.mxu1 }
 0x42b   :  { %457 = vst.msk [vmem:[#allocation2] sm:$0xff] %vm456_vm7, %v451_v0 }
 0x42c   :  { %v453_v2 = vpop.f32.mrf.mxu1 }
 0x42d   :  { %619 = shalt.err (!%p616_p4)
}
 0x42e   :  { %467 = dma.vmem_to_hbm [thread:$0]  %s465_s17, 128, %s809_s11, [#allocation3]   ;;  %v577_v3 = vpop.f32.mrf.mxu1 }
 0x42f   :  { %628 = dma.done.wait [#allocation3], 128  }
 0x430   :  { %629 = vsyncadd [#allocation3], 4294967168 }
 0x431   :  { %471 = vsyncpa [#allocation3], 1 }

</bundles_post_ra>
